<compile_context>
chip_gen: v7x
topology: tpu7x:2x2x1
jax: 0.10.0
libtpu: 0.0.40
codegen_flags: <defaults>
</compile_context>

<pallas_src>
import jax
import jax.numpy as jnp
from jax.experimental import pallas as pl
from jax.experimental.pallas import tpu as pltpu

KH = KW = 3  # 3x3 conv, SAME padding, stride 1


def _backbone_kernel(xT_ref, wT_ref, pool_ref, o_ref):
    # xT_ref:   (K+1, M)    bf16  im2col patches (transposed) + trailing ones row
    # wT_ref:   (Cout, K+1) bf16  flattened conv weight (transposed) + bias column
    # pool_ref: (M, N)      f32   per-image mean matrix (1/(H*W) on each segment)
    # o_ref:    (Cout, N)   f32   pooled feature embeddings (fc = Identity)
    y = jnp.dot(wT_ref[...], xT_ref[...],
                preferred_element_type=jnp.float32)          # conv + bias, MXU
    y = jnp.maximum(y, 0.0)                                  # ReLU, VPU
    pooled = jnp.dot(y, pool_ref[...],
                     preferred_element_type=jnp.float32)     # (Cout, N), MXU pool
    o_ref[...] = pooled.astype(o_ref.dtype)


def _im2col_nhwc(x_nhwc, kh, kw):
    """(N,H,W,C) -> (N, H*W, kh*kw*C), SAME padding for 3x3 stride-1 conv."""
    n, h, w, c = x_nhwc.shape
    xp = jnp.pad(x_nhwc, ((0, 0), (1, 1), (1, 1), (0, 0)))
    cols = []
    for dh in range(kh):
        for dw in range(kw):
            cols.append(xp[:, dh:dh + h, dw:dw + w, :])
    patches = jnp.stack(cols, axis=3)            # (N, H, W, kh*kw, C)
    return patches.reshape(n, h * w, kh * kw * c)


def prototypical_network_forward(x_nchw, w_hwio, bias):
    """Forward pass: backbone(x) with fc=Identity -> (N, Cout) embeddings."""
    n, cin, h, w = x_nchw.shape
    cout = w_hwio.shape[-1]
    k = KH * KW * cin
    m = n * h * w

    # --- wrapper glue (plain JAX): layout transpose + im2col + bias folding ---
    x_nhwc = jnp.transpose(x_nchw, (0, 2, 3, 1))
    patches = _im2col_nhwc(x_nhwc, KH, KW)                       # (N, H*W, K)
    patches_T = patches.reshape(m, k).T.astype(jnp.bfloat16)     # (K, M) lane-dense
    ones_row = jnp.ones((1, m), dtype=jnp.bfloat16)
    xT_aug = jnp.concatenate([patches_T, ones_row], axis=0)      # (K+1, M)

    w_T = w_hwio.reshape(k, cout).T                              # (Cout, K)
    w_aug = jnp.concatenate([w_T, bias.reshape(cout, 1)],
                            axis=1).astype(jnp.bfloat16)         # (Cout, K+1)

    # Per-image segment-mean matrix so pooling runs on the MXU (kept f32: it carries
    # the only averaging step, and at (M, N) it is tiny).
    seg = jnp.arange(m, dtype=jnp.int32) // (h * w)              # image id per column
    pool_T = (seg[:, None] == jnp.arange(n, dtype=jnp.int32)[None, :]
              ).astype(jnp.float32) / float(h * w)               # (M, N)

    out_T = pl.pallas_call(
        _backbone_kernel,
        out_shape=jax.ShapeDtypeStruct((cout, n), jnp.float32),
        in_specs=[pl.BlockSpec(memory_space=pltpu.MemorySpace.VMEM)] * 3,
        out_specs=pl.BlockSpec(memory_space=pltpu.MemorySpace.VMEM),
    )(xT_aug, w_aug, pool_T)

    return out_T.T.astype(x_nchw.dtype)                          # (N, Cout)


def _reference_forward(x_nchw, w_hwio, bias):
    """Pure-JAX f32 reference of the synthesized backbone."""
    x_nhwc = jnp.transpose(x_nchw, (0, 2, 3, 1))
    y = jax.lax.conv_general_dilated(
        x_nhwc, w_hwio, window_strides=(1, 1), padding="SAME",
        dimension_numbers=("NHWC", "HWIO", "NHWC"))
    y = jnp.maximum(y + bias, 0.0)
    return y.mean(axis=(1, 2))


if __name__ == "__main__":
    key = jax.random.PRNGKey(0)
    k_x, k_w, k_b = jax.random.split(key, 3)

    N, C_IN, H, W = 2, 4, 16, 16
    C_OUT = 32

    x = jax.random.normal(k_x, (N, C_IN, H, W), dtype=jnp.float32)
    # Deterministic synthetic parameters (backbone unspecified in the module).
    w_hwio = 0.1 * jax.random.normal(k_w, (KH, KW, C_IN, C_OUT), dtype=jnp.float32)
    bias = 0.05 * jax.random.normal(k_b, (C_OUT,), dtype=jnp.float32)

    feats = prototypical_network_forward(x, w_hwio, bias)
    feats = jax.block_until_ready(feats)

    ref = _reference_forward(x, w_hwio, bias)
    assert feats.shape == (N, C_OUT)
    # Slightly looser tolerance: matmul inputs (incl. folded bias) are bf16,
    # accumulation is f32.
    assert jnp.allclose(feats, ref, rtol=2e-2, atol=2e-2), "mismatch vs reference"

    print("KERNEL_OK")
</pallas_src>

<mosaic_0001>
module attributes {stable_mosaic.version = 11 : i64} {
  func.func @_backbone_kernel(%arg0: memref<37x512xbf16, #tpu.memory_space<vmem>>, %arg1: memref<32x37xbf16, #tpu.memory_space<vmem>>, %arg2: memref<512x2xf32, #tpu.memory_space<vmem>>, %arg3: memref<32x2xf32, #tpu.memory_space<vmem>>) attributes {dimension_semantics = [], scalar_prefetch = 0 : i64, scratch_operands = 0 : i64, tpu.core_type = #tpu.core_type<tc>} {
    %c0 = arith.constant 0 : index
    %c0_0 = arith.constant 0 : index
    %0 = vector.load %arg1[%c0, %c0_0] : memref<32x37xbf16, #tpu.memory_space<vmem>>, vector<32x37xbf16>
    %c0_1 = arith.constant 0 : index
    %c0_2 = arith.constant 0 : index
    %1 = vector.load %arg0[%c0_1, %c0_2] : memref<37x512xbf16, #tpu.memory_space<vmem>>, vector<37x512xbf16>
    %cst = arith.constant dense<0.000000e+00> : vector<32x512xf32>
    %2 = tpu.matmul %0, %1, %cst {dimension_numbers = #tpu.dot_dimension_numbers<[1], [0], [0], [1], [0, 0, 1, 1], [], []>} : vector<32x37xbf16>, vector<37x512xbf16>, vector<32x512xf32> -> vector<32x512xf32>
    %cst_3 = arith.constant 0.000000e+00 : f32
    %3 = vector.broadcast %cst_3 : f32 to vector<32x512xf32>
    %4 = arith.maximumf %2, %3 : vector<32x512xf32>
    %c0_4 = arith.constant 0 : index
    %c0_5 = arith.constant 0 : index
    %5 = vector.load %arg2[%c0_4, %c0_5] : memref<512x2xf32, #tpu.memory_space<vmem>>, vector<512x2xf32>
    %cst_6 = arith.constant dense<0.000000e+00> : vector<32x2xf32>
    %6 = tpu.matmul %4, %5, %cst_6 {dimension_numbers = #tpu.dot_dimension_numbers<[1], [0], [0], [1], [0, 0, 1, 1], [], []>} : vector<32x512xf32>, vector<512x2xf32>, vector<32x2xf32> -> vector<32x2xf32>
    %c0_7 = arith.constant 0 : index
    %c0_8 = arith.constant 0 : index
    %7 = vector.load %arg3[%c0_7, %c0_8] : memref<32x2xf32, #tpu.memory_space<vmem>>, vector<32x2xf32>
    tpu.vector_store %arg3[%c0_7, %c0_8], %6 {strides = array<i32>} : memref<32x2xf32, #tpu.memory_space<vmem>>, vector<32x2xf32>,
    return
  }
}

</mosaic_0001>

<bundles_post_ra>
// kernel: tpu_custom_call.1
= control target key start
LH: loop header
LB: loop body
LE: loop exit
PB: predicated region body
PF: predicated region fallthrough
CT: control target
= control target key end

     0   :  { %vm96_vm0 = vcmask 1041408   ;;  %v667_v1 = vmov 0   ;;  %vm97_vm1 = vcmask 1042432   ;;  %v668_v3 = vmov 65535   ;;  %s941_s0 = inlined_call_operand.vmem [shape: bf16[37,512], index: 0, kind: input, shape index: {}]   ;;  %s942_s1 = inlined_call_operand.vmem [shape: bf16[32,37], index: 1, kind: input, shape index: {}]   ;;  %s943_s2 = inlined_call_operand.vmem [shape: f32[512,2], index: 2, kind: input, shape index: {}]   ;;  %s944_s3 = inlined_call_operand.vmem [shape: f32[32,2], index: 3, kind: output, shape index: {}]  }
   0x1   :  { %v649_v0 = vld [vmem:[%s941_s0 + $0x4] ss:$16 sps:$4 sm:$0xff]   ;;  %144 = vmatprep.mubr.bf16.mxu0 %v667_v1  ;;  %197 = vmatprep.mubr.bf16.mxu1 %v667_v1  ;;  %v651_v2 = vld [vmem:[%s941_s0 + $0xc] ss:$16 sps:$4 sm:$0xff]   ;;  %v98_v4 = vsel %vm96_vm0, 4294967295, %v668_v3  ;;  %vm89_vm2 = vcmask 302080  }
   0x2   :  { %112 = vmatprep.subr.bf16.mxu0 %v649_v0  ;;  %v653_v5 = vld [vmem:[%s941_s0] ss:$16 sps:$4 sm:$0xff]   ;;  %v654_v6 = vld [vmem:[%s941_s0 + $0x8] ss:$16 sps:$4 sm:$0xff]   ;;  %165 = vmatprep.subr.bf16.mxu1 %v651_v2  ;;  %v655_v7 = vld [vmem:[%s941_s0 + $0x24] ss:$16 sps:$4 sm:$0xff]  }
   0x3   :  { %113 = vmatpush1.bf16.msra.mxu0 %v653_v5  ;;  %166 = vmatpush1.bf16.msra.mxu1 %v654_v6  ;;  %v657_v8 = vld [vmem:[%s941_s0 + $0x2c] ss:$16 sps:$4 sm:$0xff]   ;;  %v659_v9 = vld [vmem:[%s941_s0 + $0x20] ss:$16 sps:$4 sm:$0xff]   ;;  %v99_v10 = vsel %vm97_vm1, %v98_v4, 0  ;;  %vm468_vm3 = vcmask 15360  }
   0x4   :  { %114 = vmatprep.subr.bf16.mxu0 %v655_v7  ;;  %v660_v11 = vld [vmem:[%s941_s0 + $0x28] ss:$16 sps:$4 sm:$0xff]   ;;  %v27_v12 = vld [vmem:[%s941_s0 + $0x40] sm:$0x77]  ;;  %167 = vmatprep.subr.bf16.mxu1 %v657_v8  ;;  %v252_v33 = vld [vmem:[%s943_s2 + $0x90] sm:$0xff] }
   0x5   :  { %v28_v13 = vld [vmem:[%s941_s0 + $0x48] sm:$0x77]  ;;  %v488_v14 = vcombine.high %v27_v12, %v27_v12  ;;  %v487_v16 = vcombine.low %v27_v12, %v27_v12  ;;  %v250_v21 = vld [vmem:[%s943_s2 + $0x80] sm:$0xff]  ;;  %v253_v34 = vld [vmem:[%s943_s2 + $0x98] sm:$0xff] }
   0x6   :  { %v490_v15 = vcombine.high %v28_v13, %v28_v13  ;;  %v489_v17 = vcombine.low %v28_v13, %v28_v13  ;;  %v251_v22 = vld [vmem:[%s943_s2 + $0x88] sm:$0xff]  ;;  %v282_v23 = vld [vmem:[%s943_s2 + $0x180] sm:$0xff]  ;;  %v284_v35 = vld [vmem:[%s943_s2 + $0x190] sm:$0xff]  ;;  %v587_v41 = vpack.c.bf16 %v253_v34, %v252_v33 }
   0x7   :  { %115 = vmatpush1.bf16.msra.mxu0 %v659_v9  ;;  %168 = vmatpush1.bf16.msra.mxu1 %v660_v11  ;;  %v104_v18 = vand.u32 %v488_v14, %v99_v10  ;;  %v101_v20 = vand.u32 %v487_v16, %v99_v10  ;;  %v665_v25 = vld [vmem:[%s942_s1] sm:$0xff]   ;;  %v583_v26 = vpack.c.bf16 %v251_v22, %v250_v21  ;;  %v283_v27 = vld [vmem:[%s943_s2 + $0x188] sm:$0xff]  ;;  %v285_v36 = vld [vmem:[%s943_s2 + $0x198] sm:$0xff] }
   0x8   :  { %v110_v19 = vand.u32 %v490_v15, %v99_v10  ;;  %v107_v24 = vand.u32 %v489_v17, %v99_v10  ;;  %v234_v28 = vld [vmem:[%s943_s2] sm:$0xff]  ;;  %v235_v29 = vld [vmem:[%s943_s2 + $0x8] sm:$0xff]  ;;  %v615_v30 = vpack.c.bf16 %v283_v27, %v282_v23  ;;  %v236_v39 = vld [vmem:[%s943_s2 + $0x10] sm:$0xff]  ;;  %v619_v42 = vpack.c.bf16 %v285_v36, %v284_v35 }
   0x9   :  { %116 = vmatprep.subr.bf16.mxu0 %v104_v18  ;;  %v266_v31 = vld [vmem:[%s943_s2 + $0x100] sm:$0xff]  ;;  %v267_v32 = vld [vmem:[%s943_s2 + $0x108] sm:$0xff]  ;;  %v585_v37 = vpack.c.bf16 %v235_v29, %v234_v28  ;;  %v237_v40 = vld [vmem:[%s943_s2 + $0x18] sm:$0xff] }
   0xa   :  { %169 = vmatprep.subr.bf16.mxu1 %v110_v19  ;;  %v617_v38 = vpack.c.bf16 %v267_v32, %v266_v31  ;;  %v268_v43 = vld [vmem:[%s943_s2 + $0x110] sm:$0xff]  ;;  %v269_v44 = vld [vmem:[%s943_s2 + $0x118] sm:$0xff]  ;;  %v254_v45 = vld [vmem:[%s943_s2 + $0xa0] sm:$0xff]  ;;  %v589_v50 = vpack.c.bf16 %v237_v40, %v236_v39 }
   0xb   :  { %117 = vmatpush1.bf16.msra.mxu0 %v101_v20  ;;  %170 = vmatpush1.bf16.msra.mxu1 %v107_v24  ;;  %v255_v46 = vld [vmem:[%s943_s2 + $0xa8] sm:$0xff]  ;;  %v286_v47 = vld [vmem:[%s943_s2 + $0x1a0] sm:$0xff]  ;;  %v621_v51 = vpack.c.bf16 %v269_v44, %v268_v43  ;;  %v256_v58 = vld [vmem:[%s943_s2 + $0xb0] sm:$0xff] }
   0xc   :  { %584 = vmatprep.subr.bf16.mxu0 %v583_v26  ;;  %616 = vmatprep.subr.bf16.mxu1 %v615_v30  ;;  %v287_v48 = vld [vmem:[%s943_s2 + $0x1a8] sm:$0xff]  ;;  %v238_v52 = vld [vmem:[%s943_s2 + $0x20] sm:$0xff]  ;;  %v591_v54 = vpack.c.bf16 %v255_v46, %v254_v45  ;;  %v257_v59 = vld [vmem:[%s943_s2 + $0xb8] sm:$0xff] }
   0xd   :  { %v666_v49 = vld [vmem:[%s942_s1 + $0x8] sm:$0xff]   ;;  %v623_v55 = vpack.c.bf16 %v287_v48, %v286_v47  ;;  %v270_v56 = vld [vmem:[%s943_s2 + $0x120] sm:$0xff]  ;;  %v288_v60 = vld [vmem:[%s943_s2 + $0x1b0] sm:$0xff]  ;;  %v595_v2 = vpack.c.bf16 %v257_v59, %v256_v58 }
   0xe   :  { %491 = vmatmul.mubr.msk.bf16.vlgmr.msra.gmra.mrb[0].mxu0 %vm89_vm2, %v665_v25  ;;  %493 = vmatmul.mubr.msk.bf16.vlgmr.msra.gmra.mrb[0].mxu1 %vm89_vm2, %v665_v25  ;;  %v239_v53 = vld [vmem:[%s943_s2 + $0x28] sm:$0xff]  ;;  %v289_v61 = vld [vmem:[%s943_s2 + $0x1b8] sm:$0xff]  ;;  %v240_v0 = vld [vmem:[%s943_s2 + $0x30] sm:$0xff] }
   0xf   :  { %154 = vmatprep.mubr.bf16.mxu0 %v667_v1  ;;  %207 = vmatprep.mubr.bf16.mxu1 %v667_v1  ;;  %v271_v57 = vld [vmem:[%s943_s2 + $0x128] sm:$0xff]  ;;  %v593_v62 = vpack.c.bf16 %v239_v53, %v238_v52  ;;  %v241_v1 = vld [vmem:[%s943_s2 + $0x38] sm:$0xff]  ;;  %v627_v3 = vpack.c.bf16 %v289_v61, %v288_v60  ;;  %v272_v4 = vld [vmem:[%s943_s2 + $0x130] sm:$0xff] }
  0x10   :  { %586 = vmatpush3.bf16.msra.mxu0 %v585_v37  ;;  %618 = vmatpush3.bf16.msra.mxu1 %v617_v38  ;;  %v625_v63 = vpack.c.bf16 %v271_v57, %v270_v56  ;;  %v273_v5 = vld [vmem:[%s943_s2 + $0x138] sm:$0xff]  ;;  %v258_v6 = vld [vmem:[%s943_s2 + $0xc0] sm:$0xff]  ;;  %v259_v7 = vld [vmem:[%s943_s2 + $0xc8] sm:$0xff]  ;;  %v597_v10 = vpack.c.bf16 %v241_v1, %v240_v0 }
  0x11   :  { %588 = vmatprep.subr.bf16.mxu0 %v587_v41  ;;  %620 = vmatprep.subr.bf16.mxu1 %v619_v42  ;;  %v290_v8 = vld [vmem:[%s943_s2 + $0x1c0] sm:$0xff]  ;;  %v291_v9 = vld [vmem:[%s943_s2 + $0x1c8] sm:$0xff]  ;;  %v629_v11 = vpack.c.bf16 %v273_v5, %v272_v4  ;;  %v599_v14 = vpack.c.bf16 %v259_v7, %v258_v6  ;;  %v260_v18 = vld [vmem:[%s943_s2 + $0xd0] sm:$0xff] }
  0x12   :  { %v242_v12 = vld [vmem:[%s943_s2 + $0x40] sm:$0xff]  ;;  %v243_v13 = vld [vmem:[%s943_s2 + $0x48] sm:$0xff]  ;;  %v631_v15 = vpack.c.bf16 %v291_v9, %v290_v8  ;;  %v261_v19 = vld [vmem:[%s943_s2 + $0xd8] sm:$0xff] }
  0x13   :  { %v274_v16 = vld [vmem:[%s943_s2 + $0x140] sm:$0xff]  ;;  %v275_v17 = vld [vmem:[%s943_s2 + $0x148] sm:$0xff]  ;;  %v292_v20 = vld [vmem:[%s943_s2 + $0x1d0] sm:$0xff]  ;;  %v601_v22 = vpack.c.bf16 %v243_v13, %v242_v12  ;;  %v603_v26 = vpack.c.bf16 %v261_v19, %v260_v18 }
  0x14   :  { %590 = vmatpush3.bf16.msra.mxu0 %v589_v50  ;;  %622 = vmatpush3.bf16.msra.mxu1 %v621_v51  ;;  %v293_v21 = vld [vmem:[%s943_s2 + $0x1d8] sm:$0xff]  ;;  %v633_v23 = vpack.c.bf16 %v275_v17, %v274_v16  ;;  %v244_v24 = vld [vmem:[%s943_s2 + $0x50] sm:$0xff]  ;;  %v262_v30 = vld [vmem:[%s943_s2 + $0xe0] sm:$0xff] }
  0x15   :  { %592 = vmatprep.subr.bf16.mxu0 %v591_v54  ;;  %624 = vmatprep.subr.bf16.mxu1 %v623_v55  ;;  %v245_v25 = vld [vmem:[%s943_s2 + $0x58] sm:$0xff]  ;;  %v635_v27 = vpack.c.bf16 %v293_v21, %v292_v20  ;;  %v276_v28 = vld [vmem:[%s943_s2 + $0x150] sm:$0xff]  ;;  %v263_v31 = vld [vmem:[%s943_s2 + $0xe8] sm:$0xff] }
  0x16   :  { %492 = vmatmul.mubr.msk.bf16.gmra.mrb[4].mxu0 %vm89_vm2, %v666_v49  ;;  %494 = vmatmul.mubr.msk.bf16.gmra.mrb[4].mxu1 %vm89_vm2, %v666_v49  ;;  %v277_v29 = vld [vmem:[%s943_s2 + $0x158] sm:$0xff]  ;;  %v294_v32 = vld [vmem:[%s943_s2 + $0x1e0] sm:$0xff]  ;;  %v295_v33 = vld [vmem:[%s943_s2 + $0x1e8] sm:$0xff]  ;;  %v605_v34 = vpack.c.bf16 %v245_v25, %v244_v24  ;;  %v607_v37 = vpack.c.bf16 %v263_v31, %v262_v30 }
  0x17   :  { %v637_v35 = vpack.c.bf16 %v277_v29, %v276_v28  ;;  %v246_v36 = vld [vmem:[%s943_s2 + $0x60] sm:$0xff]  ;;  %v639_v38 = vpack.c.bf16 %v295_v33, %v294_v32  ;;  %v247_v39 = vld [vmem:[%s943_s2 + $0x68] sm:$0xff]  ;;  %v264_v44 = vld [vmem:[%s943_s2 + $0xf0] sm:$0xff] }
  0x18   :  { %594 = vmatpush3.bf16.msra.mxu0 %v593_v62  ;;  %626 = vmatpush3.bf16.msra.mxu1 %v625_v63  ;;  %v278_v40 = vld [vmem:[%s943_s2 + $0x160] sm:$0xff]  ;;  %v279_v41 = vld [vmem:[%s943_s2 + $0x168] sm:$0xff]  ;;  %v609_v42 = vpack.c.bf16 %v247_v39, %v246_v36  ;;  %v265_v45 = vld [vmem:[%s943_s2 + $0xf8] sm:$0xff] }
  0x19   :  { %596 = vmatprep.subr.bf16.mxu0 %v595_v2  ;;  %628 = vmatprep.subr.bf16.mxu1 %v627_v3  ;;  %v641_v43 = vpack.c.bf16 %v279_v41, %v278_v40  ;;  %v296_v46 = vld [vmem:[%s943_s2 + $0x1f0] sm:$0xff]  ;;  %v611_v47 = vpack.c.bf16 %v265_v45, %v264_v44  ;;  %v297_v48 = vld [vmem:[%s943_s2 + $0x1f8] sm:$0xff] }
  0x1a   :  { %v248_v49 = vld [vmem:[%s943_s2 + $0x70] sm:$0xff]  ;;  %v249_v50 = vld [vmem:[%s943_s2 + $0x78] sm:$0xff]  ;;  %v643_v51 = vpack.c.bf16 %v297_v48, %v296_v46 }
  0x1b   :  { %v613_v52 = vpack.c.bf16 %v249_v50, %v248_v49  ;;  %v280_v53 = vld [vmem:[%s943_s2 + $0x170] sm:$0xff]  ;;  %v281_v54 = vld [vmem:[%s943_s2 + $0x178] sm:$0xff] }
  0x1c   :  { %598 = vmatpush3.bf16.msra.mxu0 %v597_v10  ;;  %630 = vmatpush3.bf16.msra.mxu1 %v629_v11  ;;  %v645_v55 = vpack.c.bf16 %v281_v54, %v280_v53 }
  0x1d   :  { %600 = vmatprep.subr.bf16.mxu0 %v599_v14  ;;  %632 = vmatprep.subr.bf16.mxu1 %v631_v15 }
  0x20   :  { %602 = vmatpush3.bf16.msra.mxu0 %v601_v22  ;;  %634 = vmatpush3.bf16.msra.mxu1 %v633_v23 }
  0x21   :  { %604 = vmatprep.subr.bf16.mxu0 %v603_v26  ;;  %636 = vmatprep.subr.bf16.mxu1 %v635_v27 }
  0x24   :  { %606 = vmatpush3.bf16.msra.mxu0 %v605_v34  ;;  %638 = vmatpush3.bf16.msra.mxu1 %v637_v35 }
  0x25   :  { %608 = vmatprep.subr.bf16.mxu0 %v607_v37  ;;  %640 = vmatprep.subr.bf16.mxu1 %v639_v38 }
  0x28   :  { %610 = vmatpush3.bf16.msra.mxu0 %v609_v42  ;;  %642 = vmatpush3.bf16.msra.mxu1 %v641_v43 }
  0x29   :  { %612 = vmatprep.subr.bf16.mxu0 %v611_v47  ;;  %644 = vmatprep.subr.bf16.mxu1 %v643_v51 }
  0x2c   :  { %614 = vmatpush3.bf16.msra.mxu0 %v613_v52  ;;  %646 = vmatpush3.bf16.msra.mxu1 %v645_v55 }
  0xe1   :  { %v146_v56 = vpop.f32.mrb[0].mxu0  ;;  %v199_v57 = vpop.f32.mrb[0].mxu1 }
  0xe2   :  { %v148_v58 = vpop.f32.mrb[1].mxu0  ;;  %v201_v59 = vpop.f32.mrb[1].mxu1  ;;  %v218_v0 = vmax.f32 %v146_v56, 0.0  ;;  %v220_v1 = vmax.f32 %v199_v57, 0.0 }
  0xe3   :  { %v219_v60 = vmax.f32 %v148_v58, 0.0  ;;  %v221_v61 = vmax.f32 %v201_v59, 0.0  ;;  %v150_v62 = vpop.f32.mrb[2].mxu0  ;;  %v203_v63 = vpop.f32.mrb[2].mxu1 }
  0xe4   :  { %v152_v2 = vpop.f32.mrb[3].mxu0  ;;  %v205_v3 = vpop.f32.mrb[3].mxu1  ;;  %v222_v6 = vmax.f32 %v150_v62, 0.0  ;;  %v224_v7 = vmax.f32 %v203_v63, 0.0 }
  0xe5   :  { %v223_v4 = vmax.f32 %v152_v2, 0.0  ;;  %v225_v5 = vmax.f32 %v205_v3, 0.0  ;;  %362 = vmatprep.mubr.f32.mxu0 %v219_v60  ;;  %447 = vmatprep.mubr.f32.mxu1 %v221_v61 }
  0xe6   :  { %363 = vmatmul.mubr.f32.vlgmr.msra.gmra.mrb[8].mxu0 %v218_v0  ;;  %448 = vmatmul.mubr.f32.vlgmr.msra.gmra.mrb[8].mxu1 %v220_v1 }
  0xe7   :  { %367 = vmatprep.mubr.f32.mxu0 %v223_v4  ;;  %452 = vmatprep.mubr.f32.mxu1 %v225_v5 }
  0xe9   :  { %v156_v8 = vpop.f32.mrb[4].mxu0  ;;  %v209_v9 = vpop.f32.mrb[4].mxu1 }
  0xea   :  { %v158_v10 = vpop.f32.mrb[5].mxu0  ;;  %v211_v11 = vpop.f32.mrb[5].mxu1  ;;  %368 = vmatmul.mubr.f32.gmra.mrb[10].mxu0 %v222_v6  ;;  %453 = vmatmul.mubr.f32.gmra.mrb[10].mxu1 %v224_v7  ;;  %v226_v16 = vmax.f32 %v156_v8, 0.0  ;;  %v228_v17 = vmax.f32 %v209_v9, 0.0 }
  0xeb   :  { %v227_v12 = vmax.f32 %v158_v10, 0.0  ;;  %v229_v13 = vmax.f32 %v211_v11, 0.0  ;;  %v160_v14 = vpop.f32.mrb[6].mxu0  ;;  %v213_v15 = vpop.f32.mrb[6].mxu1 }
  0xec   :  { %v162_v18 = vpop.f32.mrb[7].mxu0  ;;  %v215_v19 = vpop.f32.mrb[7].mxu1  ;;  %v230_v22 = vmax.f32 %v160_v14, 0.0  ;;  %v232_v23 = vmax.f32 %v213_v15, 0.0 }
  0xed   :  { %v231_v20 = vmax.f32 %v162_v18, 0.0  ;;  %v233_v21 = vmax.f32 %v215_v19, 0.0  ;;  %372 = vmatprep.mubr.f32.mxu0 %v227_v12  ;;  %457 = vmatprep.mubr.f32.mxu1 %v229_v13 }
  0xee   :  { %373 = vmatmul.mubr.f32.gmra.mrb[12].mxu0 %v226_v16  ;;  %458 = vmatmul.mubr.f32.gmra.mrb[12].mxu1 %v228_v17 }
  0xef   :  { %377 = vmatprep.mubr.f32.mxu0 %v231_v20  ;;  %462 = vmatprep.mubr.f32.mxu1 %v233_v21 }
  0xf2   :  { %378 = vmatmul.mubr.f32.gmra.mrb[14].mxu0 %v230_v22  ;;  %463 = vmatmul.mubr.f32.gmra.mrb[14].mxu1 %v232_v23 }
 0x1b9   :  { %v527_v24 = vpop.f32.mrb[8].mxu0  ;;  %v571_v25 = vpop.f32.mrb[8].mxu1 }
 0x1ba   :  { %v528_v26 = vpop.f32.mrb[9].mxu0  ;;  %v572_v27 = vpop.f32.mrb[9].mxu1 }
 0x1bb   :  { %v529_v28 = vadd.f32 %v528_v26, %v527_v24  ;;  %v573_v29 = vadd.f32 %v572_v27, %v571_v25 }
 0x1bd   :  { %v450_v30 = vadd.f32 %v573_v29, %v529_v28  ;;  %v530_v31 = vpop.f32.mrb[10].mxu0  ;;  %v574_v32 = vpop.f32.mrb[10].mxu1 }
 0x1be   :  { %v531_v33 = vpop.f32.mrb[11].mxu0  ;;  %v575_v34 = vpop.f32.mrb[11].mxu1 }
 0x1bf   :  { %469 = vst.msk [vmem:[%s944_s3] sm:$0xff] %vm468_vm3, %v450_v30  ;;  %v532_v35 = vadd.f32 %v531_v33, %v530_v31  ;;  %v576_v36 = vadd.f32 %v575_v34, %v574_v32 }
 0x1c1   :  { %v455_v37 = vadd.f32 %v576_v36, %v532_v35  ;;  %v533_v38 = vpop.f32.mrb[12].mxu0  ;;  %v577_v39 = vpop.f32.mrb[12].mxu1 }
 0x1c2   :  { %v534_v40 = vpop.f32.mrb[13].mxu0  ;;  %v578_v41 = vpop.f32.mrb[13].mxu1 }
 0x1c3   :  { %470 = vst.msk [vmem:[%s944_s3 + $0x8] sm:$0xff] %vm468_vm3, %v455_v37  ;;  %v535_v42 = vadd.f32 %v534_v40, %v533_v38  ;;  %v579_v43 = vadd.f32 %v578_v41, %v577_v39 }
 0x1c5   :  { %v460_v44 = vadd.f32 %v579_v43, %v535_v42  ;;  %v536_v45 = vpop.f32.mrb[14].mxu0  ;;  %v580_v46 = vpop.f32.mrb[14].mxu1 }
 0x1c6   :  { %v537_v47 = vpop.f32.mrb[15].mxu0  ;;  %v581_v48 = vpop.f32.mrb[15].mxu1 }
 0x1c7   :  { %471 = vst.msk [vmem:[%s944_s3 + $0x10] sm:$0xff] %vm468_vm3, %v460_v44  ;;  %v538_v49 = vadd.f32 %v537_v47, %v536_v45  ;;  %v582_v50 = vadd.f32 %v581_v48, %v580_v46 }
 0x1c9   :  { %v465_v51 = vadd.f32 %v582_v50, %v538_v49 }
 0x1cb   :  { %472 = vst.msk [vmem:[%s944_s3 + $0x18] sm:$0xff] %vm468_vm3, %v465_v51 }

</bundles_post_ra>
